<compile_context>
chip_gen: v7x
topology: tpu7x:2x2x1
jax: 0.10.0
libtpu: 0.0.40
codegen_flags: <defaults>
</compile_context>

<pallas_src>
import functools

import jax
import jax.numpy as jnp
import numpy as np
from jax.experimental import pallas as pl
from jax.experimental.pallas import tpu as pltpu


def _round_up(x: int, m: int) -> int:
    return ((x + m - 1) // m) * m


def _greedy_ctc_kernel(em_ref, out_ref, carry_ref, *, num_label: int,
                       blank: int, tile_t: int):
    """em_ref: [L_pad, tile_t] logits; out_ref: [2, tile_t] int32 (idx, keep)."""
    # Init the cross-tile carry (previous tile's last argmax index) to -1.
    @pl.when(pl.program_id(0) == 0)
    def _():
        carry_ref[...] = jnp.full((1, 1), -1, dtype=jnp.int32)

    prev_carry = carry_ref[...]                                  # (1, 1) int32

    em = em_ref[...].astype(jnp.float32)                         # [L_pad, tile_t]

    # Argmax over the label (sublane) axis; first occurrence wins (matches np/torch).
    col_max = jnp.max(em, axis=0, keepdims=True)                 # [1, tile_t]
    row = jax.lax.broadcasted_iota(jnp.int32, em.shape, 0)       # label ids
    cand = jnp.where(em == col_max, row, jnp.int32(2 ** 30))
    idx = jnp.min(cand, axis=0, keepdims=True)                   # [1, tile_t]
    # NaN guard: a NaN-only column never matches col_max; clamp to a valid id
    # so host label indexing cannot go out of range.
    idx = jnp.minimum(idx, jnp.int32(num_label - 1)).astype(jnp.int32)

    # unique_consecutive + blank removal as a keep mask:
    # keep[t] = (idx[t] != idx[t-1]) AND (idx[t] != blank), idx[-1] carried
    # from the previous tile (or -1 for the very first tile).
    lane = jax.lax.broadcasted_iota(jnp.int32, idx.shape, 1)
    prev = pltpu.roll(idx, shift=1, axis=1)                      # lane rotation (XLU)
    prev = jnp.where(lane == 0, prev_carry, prev)
    keep = jnp.logical_and(idx != prev, idx != jnp.int32(blank))

    # Lane-dense stores into the fused (2, tile_t) output block.
    out_ref[0:1, :] = idx
    out_ref[1:2, :] = keep.astype(jnp.int32)

    # Carry this tile's last index forward (keepdims reduce -> (1,1), no scalar
    # extraction from a vreg needed).
    last = jnp.max(jnp.where(lane == jnp.int32(tile_t - 1), idx,
                             jnp.int32(-2147483647)),
                   axis=1, keepdims=True)
    carry_ref[...] = last


def greedy_ctc_pallas(emission: jax.Array, blank: int = 0) -> jax.Array:
    """emission: [T, L] (any float dtype) -> int32 [2, T_pad]:
       row 0 = argmax label index per timestep, row 1 = keep mask (0/1).
       Only the first T lanes are meaningful."""
    T, L = emission.shape

    # Pad label axis to a sublane multiple and time axis to a lane multiple.
    L_pad = _round_up(max(L, 8), 8)
    tile_t = 512
    T_pad = _round_up(max(T, 128), 128)
    if T_pad <= tile_t:
        tile_t = T_pad
    else:
        T_pad = _round_up(T, tile_t)

    em = emission
    if (L_pad != L) or (T_pad != T):
        if jnp.issubdtype(em.dtype, jnp.floating):
            pad_val = float(jnp.finfo(em.dtype).min)
        else:
            pad_val = 0
        em = jnp.pad(em, ((0, T_pad - T), (0, L_pad - L)),
                     constant_values=pad_val)
    # Transpose on the XLA side (not in-kernel): labels -> sublanes, time -> lanes.
    em_t = em.T                                                  # [L_pad, T_pad]

    kernel = functools.partial(_greedy_ctc_kernel, num_label=L, blank=blank,
                               tile_t=tile_t)
    grid = (T_pad // tile_t,)
    return pl.pallas_call(
        kernel,
        out_shape=jax.ShapeDtypeStruct((2, T_pad), jnp.int32),
        grid_spec=pltpu.PrefetchScalarGridSpec(
            num_scalar_prefetch=0,
            grid=grid,
            in_specs=[pl.BlockSpec((L_pad, tile_t), lambda i: (0, i))],
            out_specs=pl.BlockSpec((2, tile_t), lambda i: (0, i)),
            scratch_shapes=[pltpu.VMEM((1, 1), jnp.int32)],
        ),
        compiler_params=pltpu.CompilerParams(
            # Sequential carry of the previous tile's last index -> "arbitrary".
            # TODO(synk): on v7x the T axis could be core-split with a tiny
            # boundary fix-up pass to use both TensorCores.
            dimension_semantics=("arbitrary",),
        ),
    )(em_t)


class GreedyCTCDecoder:
    """JAX/Pallas port of the PyTorch GreedyCTCDecoder module."""

    def __init__(self, labels, blank: int = 0):
        self.labels = labels
        self.blank = blank
        self._labels_np = np.asarray(labels)

    def __call__(self, emission: jax.Array) -> str:
        T = emission.shape[0]
        out = greedy_ctc_pallas(emission, blank=self.blank)
        # Single fused D2H transfer (device_get already synchronizes).
        out_np = np.asarray(jax.device_get(out))
        idx = out_np[0, :T]
        keep = out_np[1, :T].astype(bool)
        # TODO(synk): variable-length string assembly is data-dependent; host side.
        return ''.join(self._labels_np[idx[keep]].tolist())


def _reference_decode(emission_np, labels, blank=0):
    indices = np.argmax(emission_np, axis=-1)
    out = []
    prev = None
    for i in indices:
        if i != prev:
            out.append(int(i))
        prev = i
    return ''.join(labels[i] for i in out if i != blank)


if __name__ == "__main__":
    T, L = 16, 32  # num_seq, num_label
    labels = ['-'] + [chr(ord('a') + i) for i in range(26)] + list(" '.,!")
    assert len(labels) == L

    key = jax.random.PRNGKey(0)
    emission = jax.random.normal(key, (T, L), dtype=jnp.float32)

    # Run the kernel once and block on the device result.
    raw = greedy_ctc_pallas(emission, blank=0)
    jax.block_until_ready(raw)

    decoder = GreedyCTCDecoder(labels, blank=0)
    transcript = decoder(emission)

    ref = _reference_decode(np.asarray(emission), labels, blank=0)
    assert transcript == ref, f"mismatch: kernel={transcript!r} ref={ref!r}"

    print("KERNEL_OK")
</pallas_src>

<mosaic_0001>
module attributes {stable_mosaic.version = 11 : i64} {
  func.func @_greedy_ctc_kernel(%arg0: i32, %arg1: memref<32x128xf32, #tpu.memory_space<vmem>>, %arg2: memref<2x128xi32, #tpu.memory_space<vmem>>, %arg3: memref<1x1xi32, #tpu.memory_space<vmem>>) attributes {dimension_semantics = [#tpu.dimension_semantics<arbitrary>], iteration_bounds = array<i64: 1>, scalar_prefetch = 0 : i64, scratch_operands = 1 : i64, tpu.core_type = #tpu.core_type<tc>, window_params = [{transform_indices = @transform_0, window_bounds = array<i64: 32, 128>}, {transform_indices = @transform_1, window_bounds = array<i64: 2, 128>}]} {
    %c0_i32 = arith.constant 0 : i32
    %0 = arith.cmpi eq, %arg0, %c0_i32 : i32
    %1 = arith.extui %0 : i1 to i32
    %c0_i32_0 = arith.constant 0 : i32
    %2 = arith.cmpi ne, %1, %c0_i32_0 : i32
    scf.if %2 {
      %c-1_i32 = arith.constant -1 : i32
      %37 = vector.broadcast %c-1_i32 : i32 to vector<1x1xi32>
      %c0_13 = arith.constant 0 : index
      %c0_14 = arith.constant 0 : index
      %38 = vector.load %arg3[%c0_13, %c0_14] : memref<1x1xi32, #tpu.memory_space<vmem>>, vector<1x1xi32>
      tpu.vector_store %arg3[%c0_13, %c0_14], %37 {strides = array<i32>} : memref<1x1xi32, #tpu.memory_space<vmem>>, vector<1x1xi32>,
    } else {
    }
    %c0 = arith.constant 0 : index
    %c0_1 = arith.constant 0 : index
    %3 = vector.load %arg3[%c0, %c0_1] : memref<1x1xi32, #tpu.memory_space<vmem>>, vector<1x1xi32>
    %c0_2 = arith.constant 0 : index
    %c0_3 = arith.constant 0 : index
    %4 = vector.load %arg1[%c0_2, %c0_3] : memref<32x128xf32, #tpu.memory_space<vmem>>, vector<32x128xf32>
    %cst = arith.constant dense<0xFF800000> : vector<128xf32>
    %5 = vector.multi_reduction <maximumf>, %4, %cst [0] : vector<32x128xf32> to vector<128xf32>
    %6 = vector.shape_cast %5 : vector<128xf32> to vector<1x128xf32>
    %7 = tpu.iota {dimensions = array<i32: 0>} : vector<32x128xi32>
    %8 = vector.broadcast %6 : vector<1x128xf32> to vector<32x128xf32>
    %9 = arith.cmpf oeq, %4, %8 : vector<32x128xf32>
    %c1073741824_i32 = arith.constant 1073741824 : i32
    %10 = vector.broadcast %c1073741824_i32 : i32 to vector<32x128xi32>
    %11 = arith.select %9, %7, %10 : vector<32x128xi1>, vector<32x128xi32>
    %cst_4 = arith.constant dense<2147483647> : vector<128xi32>
    %12 = vector.multi_reduction <minsi>, %11, %cst_4 [0] : vector<32x128xi32> to vector<128xi32>
    %13 = vector.shape_cast %12 : vector<128xi32> to vector<1x128xi32>
    %c31_i32 = arith.constant 31 : i32
    %14 = vector.broadcast %c31_i32 : i32 to vector<1x128xi32>
    %15 = arith.minsi %13, %14 : vector<1x128xi32>
    %16 = tpu.iota {dimensions = array<i32: 1>} : vector<1x128xi32>
    %c1_i32 = arith.constant 1 : i32
    %17 = tpu.dynamic_rotate %15 by %c1_i32 dim 1 : vector<1x128xi32>, i32 -> vector<1x128xi32>
    %c0_i32_5 = arith.constant 0 : i32
    %18 = vector.broadcast %c0_i32_5 : i32 to vector<1x128xi32>
    %19 = arith.cmpi eq, %16, %18 : vector<1x128xi32>
    %20 = vector.shape_cast %3 : vector<1x1xi32> to vector<1x1xi32>
    %21 = vector.broadcast %20 : vector<1x1xi32> to vector<1x128xi32>
    %22 = arith.select %19, %21, %17 : vector<1x128xi1>, vector<1x128xi32>
    %23 = arith.cmpi ne, %15, %22 : vector<1x128xi32>
    %c0_i32_6 = arith.constant 0 : i32
    %24 = vector.broadcast %c0_i32_6 : i32 to vector<1x128xi32>
    %25 = arith.cmpi ne, %15, %24 : vector<1x128xi32>
    %26 = arith.andi %23, %25 : vector<1x128xi1>
    %c0_7 = arith.constant 0 : index
    %c0_8 = arith.constant 0 : index
    %27 = vector.load %arg2[%c0_7, %c0_8] : memref<2x128xi32, #tpu.memory_space<vmem>>, vector<1x128xi32>
    tpu.vector_store %arg2[%c0_7, %c0_8], %15 {strides = array<i32>} : memref<2x128xi32, #tpu.memory_space<vmem>>, vector<1x128xi32>,
    %28 = arith.extui %26 : vector<1x128xi1> to vector<1x128xi32>
    %c1 = arith.constant 1 : index
    %c0_9 = arith.constant 0 : index
    %29 = vector.load %arg2[%c1, %c0_9] : memref<2x128xi32, #tpu.memory_space<vmem>>, vector<1x128xi32>
    tpu.vector_store %arg2[%c1, %c0_9], %28 {strides = array<i32>} : memref<2x128xi32, #tpu.memory_space<vmem>>, vector<1x128xi32>,
    %c127_i32 = arith.constant 127 : i32
    %30 = vector.broadcast %c127_i32 : i32 to vector<1x128xi32>
    %31 = arith.cmpi eq, %16, %30 : vector<1x128xi32>
    %c-2147483647_i32 = arith.constant -2147483647 : i32
    %32 = vector.broadcast %c-2147483647_i32 : i32 to vector<1x128xi32>
    %33 = arith.select %31, %15, %32 : vector<1x128xi1>, vector<1x128xi32>
    %cst_10 = arith.constant dense<-2147483648> : vector<1xi32>
    %34 = vector.multi_reduction <maxsi>, %33, %cst_10 [1] : vector<1x128xi32> to vector<1xi32>
    %35 = vector.shape_cast %34 : vector<1xi32> to vector<1x1xi32>
    %c0_11 = arith.constant 0 : index
    %c0_12 = arith.constant 0 : index
    %36 = vector.load %arg3[%c0_11, %c0_12] : memref<1x1xi32, #tpu.memory_space<vmem>>, vector<1x1xi32>
    tpu.vector_store %arg3[%c0_11, %c0_12], %35 {strides = array<i32>} : memref<1x1xi32, #tpu.memory_space<vmem>>, vector<1x1xi32>,
    return
  }
  func.func @transform_0(%arg0: i32) -> (i32, i32) {
    %c0_i32 = arith.constant 0 : i32
    %c0_i32_0 = arith.constant 0 : i32
    return %c0_i32, %arg0 : i32, i32
  }
  func.func @transform_1(%arg0: i32) -> (i32, i32) {
    %c0_i32 = arith.constant 0 : i32
    %c0_i32_0 = arith.constant 0 : i32
    return %c0_i32, %arg0 : i32, i32
  }
}

</mosaic_0001>

<bundles_post_ra>
// kernel: tpu_custom_call.1
= control target key start
LH: loop header
LB: loop body
LE: loop exit
PB: predicated region body
PF: predicated region fallthrough
CT: control target
= control target key end

     0   :  { %6 = vsyncpa [#allocation4], 0  ;;  %s225_s0 = inlined_call_operand.hbm [shape: f32[32,128], index: 0, kind: input, shape index: {}]   ;;  %s226_s1 = inlined_call_operand.hbm [shape: s32[2,128], index: 1, kind: output, shape index: {}]  }
   0x1   :  { %7 = vsyncpa [#allocation5], 0  ;;  %s182_s6 = smov [#allocation3]   ;;  %s134_s10 = scalar_lea.hbm %s225_s0, 512 }
   0x2   :  { %s13_s7 = sshll.u32 %s182_s6, 4  ;;  %p135_p0 = scmp.ne.s32.totalorder %s225_s0, %s134_s10  ;;  %s14_s7 = int_to_ptr.vmem [resolvable:$true] %s13_s7 }
   0x3   :  { %p138_p1 = scmp.lt.u32.totalorder %s134_s10, %s225_s0 }
   0x5   :  { %p140_p2 = pnand %p138_p1, %p135_p0 }
   0x7   :  { %143 = shalt.err (!%p140_p2)
}
   0x8   :  { %s144_s15 = scalar_lea.vmem %s14_s7, 512  ;;  %p149_p4 = scmp.lt.s32.totalorder %s14_s7, %s14_s7 }
   0x9   :  { %p145_p3 = scmp.ne.s32.totalorder %s14_s7, %s144_s15  ;;  %p150_p5 = scmp.lt.s32.totalorder %s144_s15, %s144_s15 }
   0xb   :  { %p151_p6 = por %p150_p5, %p149_p4 }
   0xd   :  { %p152_p7 = pnand %p151_p6, %p145_p3 }
   0xf   :  { %155 = shalt.err (!%p152_p7)
}
  0x10   :  { %s183_s16 = smov 128   ;;  %s184_s17 = smov 8  }
  0x11   :  { %19 = dma.hbm_to_vmem [thread:$0]  %s225_s0, 512, %s14_s7, [#allocation4], %s183_s16, %s183_s16, %s184_s17  }
  0x12   :  { %178 = dma.done.wait [#allocation4], 512  }
  0x13   :  { %179 = vsyncadd [#allocation4], 4294966784  ;;  %vm27_vm0 = vcmask 0   ;;  %v185_v0 = vmov 4294967295   ;;  %v30_v1 = vld [vmem:[#allocation3] sm:$0xff]  ;;  %v31_v2 = vld [vmem:[#allocation3 + $0x8] sm:$0xff]  ;;  %v43_v9 = vlaneseq }
  0x14   :  { %28 = vst.msk [vmem:[#allocation2] sm:$0x1] %vm27_vm0, %v185_v0  ;;  %v32_v3 = vld [vmem:[#allocation3 + $0x10] sm:$0xff]  ;;  %v33_v4 = vld [vmem:[#allocation3 + $0x18] sm:$0xff]  ;;  %v34_v5 = vmax.f32 %v30_v1, %v31_v2  ;;  %v186_v38 = vmov 0   ;;  %s187_s0 = smov 1  }
  0x15   :  { %v35_v6 = vmax.f32 %v32_v3, %v33_v4  ;;  %v44_v12 = vshrl.u32 %v43_v9, 7  ;;  %v74_v30 = vand.u32 127, %v43_v9  ;;  %132 = vset.pattern.permute.xlu1 %v186_v38  ;;  %133 = vset.pattern.permute.xlu0 %v186_v38  ;;  %s188_s20 = smov [#allocation6]  }
  0x16   :  { %s116_s21 = sshll.u32 %s188_s20, 4  ;;  %s117_s21 = int_to_ptr.vmem [resolvable:$true] %s116_s21 }
  0x17   :  { %v36_v7 = vmax.f32 %v34_v5, %v35_v6  ;;  %v45_v15 = vadd.s32 8, %v44_v12  ;;  %v46_v16 = vadd.s32 16, %v44_v12  ;;  %v47_v17 = vadd.s32 24, %v44_v12  ;;  %s156_s22 = scalar_lea.vmem %s117_s21, 32  ;;  %p161_p9 = scmp.lt.s32.totalorder %s117_s21, %s117_s21 }
  0x18   :  { %vm92_vm11 = vcmp.eq.s32.totalorder %v74_v30, 127  ;;  %v83_v42 = vsub.s32 0, %v44_v12  ;;  %vm77_vm14 = vcmp.eq.s32.totalorder %v74_v30, 0  ;;  %p157_p8 = scmp.ne.s32.totalorder %s117_s21, %s156_s22  ;;  %p162_p10 = scmp.lt.s32.totalorder %s156_s22, %s156_s22 }
  0x19   :  { %v37_v8 = vrot.slane %v36_v7, 4 }
  0x1a   :  { %p163_p11 = por %p162_p10, %p161_p9 }
  0x1b   :  { %v38_v10 = vmax.f32 %v36_v7, %v37_v8  ;;  %v29_v37 = vld [vmem:[#allocation2] sm:$0x1] }
  0x1c   :  { %79 = vperm.xlu1 %132, %v29_v37   ;;  %p164_p12 = pnand %p163_p11, %p157_p8 }
  0x1d   :  { %v39_v11 = vrot.slane %v38_v10, 2 }
  0x1f   :  { %v40_v13 = vmax.f32 %v38_v10, %v39_v11 }
  0x21   :  { %v41_v14 = vrot.slane %v40_v13, 1 }
  0x23   :  { %v42_v18 = vmax.f32 %v40_v13, %v41_v14 }
  0x25   :  { %vm48_vm1 = vcmp.eq.f32.partialorder %v30_v1, %v42_v18  ;;  %vm49_vm2 = vcmp.eq.f32.partialorder %v31_v2, %v42_v18  ;;  %vm50_vm3 = vcmp.eq.f32.partialorder %v32_v3, %v42_v18  ;;  %vm51_vm4 = vcmp.eq.f32.partialorder %v33_v4, %v42_v18 }
  0x26   :  { %v52_v19 = vsel %vm48_vm1, %v44_v12, 1073741824  ;;  %v53_v20 = vsel %vm49_vm2, %v45_v15, 1073741824  ;;  %v54_v21 = vsel %vm50_vm3, %v46_v16, 1073741824  ;;  %v55_v22 = vsel %vm51_vm4, %v47_v17, 1073741824 }
  0x27   :  { %vm56_vm5 = vcmp.lt.s32.totalorder %v52_v19, %v53_v20  ;;  %vm58_vm6 = vcmp.lt.s32.totalorder %v54_v21, %v55_v22 }
  0x28   :  { %v57_v23 = vsel %vm56_vm5, %v52_v19, %v53_v20  ;;  %v59_v24 = vsel %vm58_vm6, %v54_v21, %v55_v22 }
  0x29   :  { %vm60_vm7 = vcmp.lt.s32.totalorder %v57_v23, %v59_v24 }
  0x2a   :  { %v61_v25 = vsel %vm60_vm7, %v57_v23, %v59_v24 }
  0x2b   :  { %v62_v26 = vrot.slane %v61_v25, 4 }
  0x2d   :  { %vm63_vm8 = vcmp.lt.s32.totalorder %v61_v25, %v62_v26 }
  0x2e   :  { %v64_v27 = vsel %vm63_vm8, %v61_v25, %v62_v26 }
  0x2f   :  { %v65_v28 = vrot.slane %v64_v27, 2 }
  0x31   :  { %vm66_vm9 = vcmp.lt.s32.totalorder %v64_v27, %v65_v28 }
  0x32   :  { %v67_v29 = vsel %vm66_vm9, %v64_v27, %v65_v28 }
  0x33   :  { %v68_v31 = vrot.slane %v67_v29, 1 }
  0x35   :  { %vm69_vm10 = vcmp.lt.s32.totalorder %v67_v29, %v68_v31 }
  0x36   :  { %v70_v32 = vsel %vm69_vm10, %v67_v29, %v68_v31 }
  0x37   :  { %vm71_vm12 = vcmp.lt.s32.totalorder %v70_v32, 31 }
  0x38   :  { %v72_v33 = vsel %vm71_vm12, %v70_v32, 31 }
  0x39   :  { %v93_v34 = vsel %vm92_vm11, %v72_v33, 2147483649  ;;  %89 = vst [vmem:[#allocation6] sm:$0x1] %v72_v33  ;;  %75 = vrot.lane.b32.xlu1 %v72_v33, %s187_s0  ;;  %vm87_vm15 = vcmp.ne.s32.totalorder %v72_v33, 0 }
  0x3a   :  { %v95_v35 = vshra.s32 %v93_v34, 16  ;;  %v94_v39 = vand.u32 65535, %v93_v34 }
  0x3c   :  { %v97_v36 = vcvt.s32.f32 %v95_v35  ;;  %v96_v40 = vcvt.s32.f32 %v94_v39 }
  0x3e   :  { %98 = vmax.xlane.f32.xlu0 %v97_v36 }
  0x9b   :  { %v80_v44 = vpop.permute.xlu1 %79 }
  0x9c   :  { %v84_v45 = vrot.slane %v80_v44, %v83_v42 }
  0xab   :  { %v76_v46 = vpop.permute.xlu1 %75 }
  0xac   :  { %v85_v47 = vsel %vm77_vm14, %v84_v45, %v76_v46 }
  0xad   :  { %vm86_vm1 = vcmp.ne.s32.totalorder %v72_v33, %v85_v47 }
  0xae   :  { %vm88_vm2 = vmand %vm86_vm1, %vm87_vm15 }
  0xaf   :  { %v90_v48 = vsel %vm88_vm2, 1, %v186_v38 }
  0xb0   :  { %91 = vst [vmem:[#allocation6 + $0x1] sm:$0x1] %v90_v48 }
  0xcb   :  { %v99_v41 = vpop.xlane.xlu0 %98 }
  0xcc   :  { %vm100_vm13 = vcmp.eq.f32.partialorder %v97_v36, %v99_v41 }
  0xcd   :  { %v101_v43 = vsel %vm100_vm13, %v96_v40, -inf }
  0xce   :  { %102 = vmax.xlane.f32.xlu0 %v101_v43 }
  0xcf   :  { %167 = shalt.err (!%p164_p12)
}
  0xd0   :  { %s168_s25 = scalar_lea.hbm %s226_s1, 32 }
  0xd1   :  { %p169_p13 = scmp.ne.s32.totalorder %s226_s1, %s168_s25  ;;  %p172_p0 = scmp.lt.u32.totalorder %s168_s25, %s226_s1 }
  0xd3   :  { %p174_p1 = pnand %p172_p0, %p169_p13 }
  0xd5   :  { %177 = shalt.err (!%p174_p1)
}
  0xd6   :  { %119 = dma.vmem_to_hbm [thread:$0]  %s117_s21, 32, %s226_s1, [#allocation5]   ;;  %v105_v49 = vcvt.f32.s32 %v99_v41 }
  0xd8   :  { %v106_v51 = vshll.u32 %v105_v49, 16 }
 0x15b   :  { %v103_v50 = vpop.xlane.xlu0 %102 }
 0x15c   :  { %v104_v52 = vcvt.f32.s32 %v103_v50 }
 0x15e   :  { %v107_v53 = vadd.s32 %v106_v51, %v104_v52 }
 0x160   :  { %109 = vst.msk [vmem:[#allocation2] sm:$0x1] %vm27_vm0, %v107_v53 }
 0x161   :  { %180 = dma.done.wait [#allocation5], 32  }
 0x162   :  { %181 = vsyncadd [#allocation5], 4294967264 }
 0x163   :  { %123 = vsyncpa [#allocation4], 1 }
 0x164   :  { %124 = vsyncpa [#allocation5], 1 }

</bundles_post_ra>
